<compile_context>
chip_gen: v6e
topology: v6e:2x2x1
jax: 0.10.0
libtpu: 0.0.40
codegen_flags: <defaults>
</compile_context>

<pallas_src>
import functools

import jax
import jax.numpy as jnp
from jax.experimental import pallas as pl
from jax.experimental.pallas import tpu as pltpu

LANES = 128
_MAX_TILE = 512
_VMEM_LIMIT_BYTES = 64 * 1024 * 1024


def _round_up(x, m):
    return ((x + m - 1) // m) * m


# ----------------------------------------------------------------------------
# Pallas kernel 1: feature transform  XW = X @ W   (bf16 in, f32 acc, bf16 out)
# ----------------------------------------------------------------------------
def _feature_transform_kernel(x_ref, w_ref, o_ref):
    o_ref[...] = jnp.dot(
        x_ref[...], w_ref[...], preferred_element_type=jnp.float32
    ).astype(o_ref.dtype)


def feature_transform(x_bf16, w_bf16, *, tile_m):
    n_pad, f_in = x_bf16.shape
    f_out = w_bf16.shape[1]
    return pl.pallas_call(
        _feature_transform_kernel,
        out_shape=jax.ShapeDtypeStruct((n_pad, f_out), jnp.bfloat16),
        grid_spec=pltpu.PrefetchScalarGridSpec(
            num_scalar_prefetch=0,
            grid=(n_pad // tile_m,),
            in_specs=[
                pl.BlockSpec((tile_m, f_in), lambda i: (i, 0)),
                pl.BlockSpec((f_in, f_out), lambda i: (0, 0)),
            ],
            out_specs=pl.BlockSpec((tile_m, f_out), lambda i: (i, 0)),
        ),
        compiler_params=pltpu.CompilerParams(
            dimension_semantics=("parallel",),
            vmem_limit_bytes=_VMEM_LIMIT_BYTES,
        ),
    )(x_bf16, w_bf16)


# ----------------------------------------------------------------------------
# Pallas kernel 2: tiled aggregation  out = act(A_hat @ XW + b)
#   grid = (N/TM, N/TK); f32 accumulator scratch, init/finalize via pl.when.
#   Bias add + ReLU + down-cast are fused into the finalize step.
# ----------------------------------------------------------------------------
def _aggregate_kernel(a_ref, xw_ref, b_ref, o_ref, acc_ref, *, apply_relu):
    k = pl.program_id(1)

    @pl.when(k == 0)
    def _():
        acc_ref[...] = jnp.zeros_like(acc_ref)

    acc_ref[...] += jnp.dot(
        a_ref[...], xw_ref[...], preferred_element_type=jnp.float32
    )

    @pl.when(k == pl.num_programs(1) - 1)
    def _():
        out = acc_ref[...] + b_ref[...]  # b_ref is (1, Fout) -> broadcasts
        if apply_relu:
            out = jnp.maximum(out, 0.0)
        o_ref[...] = out.astype(o_ref.dtype)


def aggregate(a_bf16, xw_bf16, b_f32, *, tile_m, tile_k, apply_relu, out_dtype):
    n_pad = a_bf16.shape[0]
    f_out = xw_bf16.shape[1]
    grid = (n_pad // tile_m, n_pad // tile_k)
    kernel = functools.partial(_aggregate_kernel, apply_relu=apply_relu)
    return pl.pallas_call(
        kernel,
        out_shape=jax.ShapeDtypeStruct((n_pad, f_out), out_dtype),
        grid_spec=pltpu.PrefetchScalarGridSpec(
            num_scalar_prefetch=0,
            grid=grid,
            in_specs=[
                pl.BlockSpec((tile_m, tile_k), lambda i, k: (i, k)),
                pl.BlockSpec((tile_k, f_out), lambda i, k: (k, 0)),
                pl.BlockSpec((1, f_out), lambda i, k: (0, 0)),
            ],
            out_specs=pl.BlockSpec((tile_m, f_out), lambda i, k: (i, 0)),
            scratch_shapes=[pltpu.VMEM((tile_m, f_out), jnp.float32)],
        ),
        compiler_params=pltpu.CompilerParams(
            dimension_semantics=("parallel", "arbitrary"),
            vmem_limit_bytes=_VMEM_LIMIT_BYTES,
        ),
    )(a_bf16, xw_bf16, b_f32)


def gcn_layer(a_hat_bf16, x_bf16, w_pad_bf16, b_pad_f32, *, tile_m, tile_k,
              apply_relu):
    """One GCN layer on padded / lane-dense operands."""
    xw = feature_transform(x_bf16, w_pad_bf16, tile_m=tile_m)
    out_dtype = jnp.bfloat16 if apply_relu else jnp.float32
    return aggregate(a_hat_bf16, xw, b_pad_f32,
                     tile_m=tile_m, tile_k=tile_k, apply_relu=apply_relu,
                     out_dtype=out_dtype)


# ----------------------------------------------------------------------------
# Glue: dense normalized adjacency from edge_index (PyG GCNConv convention)
#   A[target, source] = 1, self-loops added, D^-1/2 (A+I) D^-1/2.
#   Assumes edge_index already contains both directions of undirected edges
#   (standard PyG convention) and no pre-existing self-loops.
# ----------------------------------------------------------------------------
def build_normalized_adjacency(edge_index, num_nodes):
    src = edge_index[0]
    dst = edge_index[1]
    a = jnp.eye(num_nodes, dtype=jnp.float32)              # self loops
    a = a.at[dst, src].set(1.0)                            # A[target, source]
    deg = a.sum(axis=1)                                    # degree incl. self loop
    d_inv_sqrt = 1.0 / jnp.sqrt(deg)
    return a * d_inv_sqrt[:, None] * d_inv_sqrt[None, :]


# ----------------------------------------------------------------------------
# Full forward (jitted): adjacency build + all layers + argmax.
# ----------------------------------------------------------------------------
def _gcn_forward_impl(weights, biases, x, edge_index):
    n, f_in = x.shape
    num_layers = len(weights)

    # Tile sizes derived from static shapes: cap at 512, round N up to tile.
    tile = min(_MAX_TILE, _round_up(n, LANES))
    n_pad = _round_up(n, tile)

    # Normalized adjacency, padded + cast once; reused by every layer.
    a_hat = build_normalized_adjacency(edge_index, n)
    a_hat = jnp.pad(a_hat, ((0, n_pad - n), (0, n_pad - n))).astype(jnp.bfloat16)

    f_in_pad = _round_up(f_in, LANES)
    h = jnp.pad(x, ((0, n_pad - n), (0, f_in_pad - f_in))).astype(jnp.bfloat16)

    logits = None
    for i, (w, b) in enumerate(zip(weights, biases)):
        in_ch, out_ch = w.shape
        in_pad = _round_up(in_ch, LANES)
        out_pad = _round_up(out_ch, LANES)
        w_pad = jnp.pad(w, ((0, in_pad - in_ch), (0, out_pad - out_ch)))
        w_pad = w_pad.astype(jnp.bfloat16)
        b_pad = jnp.pad(b, (0, out_pad - out_ch)).reshape(1, out_pad)
        b_pad = b_pad.astype(jnp.float32)

        apply_relu = i < num_layers - 1
        out = gcn_layer(a_hat, h, w_pad, b_pad,
                        tile_m=tile, tile_k=tile, apply_relu=apply_relu)
        if apply_relu:
            h = out                        # already bf16; dropout = identity (eval)
        else:
            logits = out[:n, :out_ch]      # strip node + lane padding (f32)

    pred = jnp.argmax(logits, axis=-1)
    return logits, pred


_gcn_forward = jax.jit(_gcn_forward_impl)


# ----------------------------------------------------------------------------
# GCN module (forward only, eval mode)
# ----------------------------------------------------------------------------
class GCNPallas:
    def __init__(self, in_channels, hidden_channels, num_classes, num_layers,
                 key):
        self.num_layers = num_layers
        self.weights = []
        self.biases = []
        dims = []
        for i in range(num_layers):
            in_ch = in_channels if i == 0 else hidden_channels
            out_ch = num_classes if i == num_layers - 1 else hidden_channels
            dims.append((in_ch, out_ch))
        keys = jax.random.split(key, num_layers)
        for (in_ch, out_ch), k in zip(dims, keys):
            limit = jnp.sqrt(6.0 / (in_ch + out_ch))
            w = jax.random.uniform(k, (in_ch, out_ch), jnp.float32,
                                   -limit, limit)
            b = jnp.zeros((out_ch,), jnp.float32)
            self.weights.append(w)
            self.biases.append(b)

    def forward(self, x, edge_index):
        return _gcn_forward(self.weights, self.biases, x, edge_index)


# ----------------------------------------------------------------------------
if __name__ == "__main__":
    key = jax.random.PRNGKey(0)
    k_x, k_e, k_w = jax.random.split(key, 3)

    num_nodes = 8
    in_channels = 16
    hidden_channels = 32
    num_classes = 4
    num_layers = 3
    num_edges = 20

    x = jax.random.normal(k_x, (num_nodes, in_channels), dtype=jnp.float32)
    edge_index = jax.random.randint(k_e, (2, num_edges), 0, num_nodes,
                                    dtype=jnp.int32)

    model = GCNPallas(in_channels, hidden_channels, num_classes, num_layers,
                      k_w)
    logits, pred = model.forward(x, edge_index)
    jax.block_until_ready(logits)
    jax.block_until_ready(pred)

    assert logits.shape == (num_nodes, num_classes)
    assert pred.shape == (num_nodes,)
    assert logits.dtype == jnp.float32
    print("KERNEL_OK")
</pallas_src>

<mosaic_0001>
module attributes {stable_mosaic.version = 11 : i64} {
  func.func @_feature_transform_kernel(%arg0: i32, %arg1: memref<128x128xbf16, #tpu.memory_space<vmem>>, %arg2: memref<128x128xbf16, #tpu.memory_space<vmem>>, %arg3: memref<128x128xbf16, #tpu.memory_space<vmem>>) attributes {dimension_semantics = [#tpu.dimension_semantics<parallel>], iteration_bounds = array<i64: 1>, scalar_prefetch = 0 : i64, scratch_operands = 0 : i64, tpu.core_type = #tpu.core_type<tc>, window_params = [{transform_indices = @transform_0, window_bounds = array<i64: 128, 128>}, {pipeline_mode = #tpu.pipeline_mode<synchronous>, transform_indices = @transform_1, window_bounds = array<i64: 128, 128>}, {transform_indices = @transform_2, window_bounds = array<i64: 128, 128>}]} {
    %c0 = arith.constant 0 : index
    %c0_0 = arith.constant 0 : index
    %0 = vector.load %arg1[%c0, %c0_0] : memref<128x128xbf16, #tpu.memory_space<vmem>>, vector<128x128xbf16>
    %c0_1 = arith.constant 0 : index
    %c0_2 = arith.constant 0 : index
    %1 = vector.load %arg2[%c0_1, %c0_2] : memref<128x128xbf16, #tpu.memory_space<vmem>>, vector<128x128xbf16>
    %cst = arith.constant dense<0.000000e+00> : vector<128x128xf32>
    %2 = tpu.matmul %0, %1, %cst {dimension_numbers = #tpu.dot_dimension_numbers<[1], [0], [0], [1], [0, 0, 1, 1], [], []>} : vector<128x128xbf16>, vector<128x128xbf16>, vector<128x128xf32> -> vector<128x128xf32>
    %3 = arith.truncf %2 : vector<128x128xf32> to vector<128x128xbf16>
    %c0_3 = arith.constant 0 : index
    %c0_4 = arith.constant 0 : index
    %4 = vector.load %arg3[%c0_3, %c0_4] : memref<128x128xbf16, #tpu.memory_space<vmem>>, vector<128x128xbf16>
    tpu.vector_store %arg3[%c0_3, %c0_4], %3 {strides = array<i32>} : memref<128x128xbf16, #tpu.memory_space<vmem>>, vector<128x128xbf16>,
    return
  }
  func.func @transform_0(%arg0: i32) -> (i32, i32) {
    %c0_i32 = arith.constant 0 : i32
    %c0_i32_0 = arith.constant 0 : i32
    return %arg0, %c0_i32 : i32, i32
  }
  func.func @transform_1(%arg0: i32) -> (i32, i32) {
    %c0_i32 = arith.constant 0 : i32
    %c0_i32_0 = arith.constant 0 : i32
    %c0_i32_1 = arith.constant 0 : i32
    return %c0_i32, %c0_i32_0 : i32, i32
  }
  func.func @transform_2(%arg0: i32) -> (i32, i32) {
    %c0_i32 = arith.constant 0 : i32
    %c0_i32_0 = arith.constant 0 : i32
    return %arg0, %c0_i32 : i32, i32
  }
}

module attributes {stable_mosaic.version = 11 : i64} {
  func.func @_aggregate_kernel(%arg0: i32, %arg1: i32, %arg2: memref<128x128xbf16, #tpu.memory_space<vmem>>, %arg3: memref<128x128xbf16, #tpu.memory_space<vmem>>, %arg4: memref<1x128xf32, #tpu.memory_space<vmem>>, %arg5: memref<128x128xbf16, #tpu.memory_space<vmem>>, %arg6: memref<128x128xf32, #tpu.memory_space<vmem>>) attributes {dimension_semantics = [#tpu.dimension_semantics<parallel>, #tpu.dimension_semantics<arbitrary>], iteration_bounds = array<i64: 1, 1>, scalar_prefetch = 0 : i64, scratch_operands = 1 : i64, tpu.core_type = #tpu.core_type<tc>, window_params = [{transform_indices = @transform_0, window_bounds = array<i64: 128, 128>}, {transform_indices = @transform_1, window_bounds = array<i64: 128, 128>}, {pipeline_mode = #tpu.pipeline_mode<synchronous>, transform_indices = @transform_2, window_bounds = array<i64: 1, 128>}, {transform_indices = @transform_3, window_bounds = array<i64: 128, 128>}]} {
    %c0_i32 = arith.constant 0 : i32
    %0 = arith.cmpi eq, %arg1, %c0_i32 : i32
    %1 = arith.extui %0 : i1 to i32
    %c0_i32_0 = arith.constant 0 : i32
    %2 = arith.cmpi ne, %1, %c0_i32_0 : i32
    scf.if %2 {
      %cst_10 = arith.constant 0.000000e+00 : f32
      %12 = vector.broadcast %cst_10 : f32 to vector<128x128xf32>
      %c0_11 = arith.constant 0 : index
      %c0_12 = arith.constant 0 : index
      %13 = vector.load %arg6[%c0_11, %c0_12] : memref<128x128xf32, #tpu.memory_space<vmem>>, vector<128x128xf32>
      tpu.vector_store %arg6[%c0_11, %c0_12], %12 {strides = array<i32>} : memref<128x128xf32, #tpu.memory_space<vmem>>, vector<128x128xf32>,
    } else {
    }
    %c0 = arith.constant 0 : index
    %c0_1 = arith.constant 0 : index
    %3 = vector.load %arg6[%c0, %c0_1] : memref<128x128xf32, #tpu.memory_space<vmem>>, vector<128x128xf32>
    %c0_2 = arith.constant 0 : index
    %c0_3 = arith.constant 0 : index
    %4 = vector.load %arg2[%c0_2, %c0_3] : memref<128x128xbf16, #tpu.memory_space<vmem>>, vector<128x128xbf16>
    %c0_4 = arith.constant 0 : index
    %c0_5 = arith.constant 0 : index
    %5 = vector.load %arg3[%c0_4, %c0_5] : memref<128x128xbf16, #tpu.memory_space<vmem>>, vector<128x128xbf16>
    %cst = arith.constant dense<0.000000e+00> : vector<128x128xf32>
    %6 = tpu.matmul %4, %5, %cst {dimension_numbers = #tpu.dot_dimension_numbers<[1], [0], [0], [1], [0, 0, 1, 1], [], []>} : vector<128x128xbf16>, vector<128x128xbf16>, vector<128x128xf32> -> vector<128x128xf32>
    %7 = arith.addf %3, %6 : vector<128x128xf32>
    %c0_6 = arith.constant 0 : index
    %c0_7 = arith.constant 0 : index
    %8 = vector.load %arg6[%c0_6, %c0_7] : memref<128x128xf32, #tpu.memory_space<vmem>>, vector<128x128xf32>
    tpu.vector_store %arg6[%c0_6, %c0_7], %7 {strides = array<i32>} : memref<128x128xf32, #tpu.memory_space<vmem>>, vector<128x128xf32>,
    %c0_i32_8 = arith.constant 0 : i32
    %9 = arith.cmpi eq, %arg1, %c0_i32_8 : i32
    %10 = arith.extui %9 : i1 to i32
    %c0_i32_9 = arith.constant 0 : i32
    %11 = arith.cmpi ne, %10, %c0_i32_9 : i32
    scf.if %11 {
      %c0_10 = arith.constant 0 : index
      %c0_11 = arith.constant 0 : index
      %12 = vector.load %arg6[%c0_10, %c0_11] : memref<128x128xf32, #tpu.memory_space<vmem>>, vector<128x128xf32>
      %c0_12 = arith.constant 0 : index
      %c0_13 = arith.constant 0 : index
      %13 = vector.load %arg4[%c0_12, %c0_13] : memref<1x128xf32, #tpu.memory_space<vmem>>, vector<1x128xf32>
      %14 = vector.broadcast %13 : vector<1x128xf32> to vector<128x128xf32>
      %15 = arith.addf %12, %14 : vector<128x128xf32>
      %cst_14 = arith.constant 0.000000e+00 : f32
      %16 = vector.broadcast %cst_14 : f32 to vector<128x128xf32>
      %17 = arith.maximumf %15, %16 : vector<128x128xf32>
      %18 = arith.truncf %17 : vector<128x128xf32> to vector<128x128xbf16>
      %c0_15 = arith.constant 0 : index
      %c0_16 = arith.constant 0 : index
      %19 = vector.load %arg5[%c0_15, %c0_16] : memref<128x128xbf16, #tpu.memory_space<vmem>>, vector<128x128xbf16>
      tpu.vector_store %arg5[%c0_15, %c0_16], %18 {strides = array<i32>} : memref<128x128xbf16, #tpu.memory_space<vmem>>, vector<128x128xbf16>,
    } else {
    }
    return
  }
  func.func @transform_0(%arg0: i32, %arg1: i32) -> (i32, i32) {
    %c0_i32 = arith.constant 0 : i32
    return %arg0, %arg1 : i32, i32
  }
  func.func @transform_1(%arg0: i32, %arg1: i32) -> (i32, i32) {
    %c0_i32 = arith.constant 0 : i32
    %c0_i32_0 = arith.constant 0 : i32
    return %arg1, %c0_i32 : i32, i32
  }
  func.func @transform_2(%arg0: i32, %arg1: i32) -> (i32, i32) {
    %c0_i32 = arith.constant 0 : i32
    %c0_i32_0 = arith.constant 0 : i32
    %c0_i32_1 = arith.constant 0 : i32
    return %c0_i32, %c0_i32_0 : i32, i32
  }
  func.func @transform_3(%arg0: i32, %arg1: i32) -> (i32, i32) {
    %c0_i32 = arith.constant 0 : i32
    %c0_i32_0 = arith.constant 0 : i32
    return %arg0, %c0_i32 : i32, i32
  }
}

module attributes {stable_mosaic.version = 11 : i64} {
  func.func @_aggregate_kernel(%arg0: i32, %arg1: i32, %arg2: memref<128x128xbf16, #tpu.memory_space<vmem>>, %arg3: memref<128x128xbf16, #tpu.memory_space<vmem>>, %arg4: memref<1x128xf32, #tpu.memory_space<vmem>>, %arg5: memref<128x128xf32, #tpu.memory_space<vmem>>, %arg6: memref<128x128xf32, #tpu.memory_space<vmem>>) attributes {dimension_semantics = [#tpu.dimension_semantics<parallel>, #tpu.dimension_semantics<arbitrary>], iteration_bounds = array<i64: 1, 1>, scalar_prefetch = 0 : i64, scratch_operands = 1 : i64, tpu.core_type = #tpu.core_type<tc>, window_params = [{transform_indices = @transform_0, window_bounds = array<i64: 128, 128>}, {transform_indices = @transform_1, window_bounds = array<i64: 128, 128>}, {pipeline_mode = #tpu.pipeline_mode<synchronous>, transform_indices = @transform_2, window_bounds = array<i64: 1, 128>}, {transform_indices = @transform_3, window_bounds = array<i64: 128, 128>}]} {
    %c0_i32 = arith.constant 0 : i32
    %0 = arith.cmpi eq, %arg1, %c0_i32 : i32
    %1 = arith.extui %0 : i1 to i32
    %c0_i32_0 = arith.constant 0 : i32
    %2 = arith.cmpi ne, %1, %c0_i32_0 : i32
    scf.if %2 {
      %cst_10 = arith.constant 0.000000e+00 : f32
      %12 = vector.broadcast %cst_10 : f32 to vector<128x128xf32>
      %c0_11 = arith.constant 0 : index
      %c0_12 = arith.constant 0 : index
      %13 = vector.load %arg6[%c0_11, %c0_12] : memref<128x128xf32, #tpu.memory_space<vmem>>, vector<128x128xf32>
      tpu.vector_store %arg6[%c0_11, %c0_12], %12 {strides = array<i32>} : memref<128x128xf32, #tpu.memory_space<vmem>>, vector<128x128xf32>,
    } else {
    }
    %c0 = arith.constant 0 : index
    %c0_1 = arith.constant 0 : index
    %3 = vector.load %arg6[%c0, %c0_1] : memref<128x128xf32, #tpu.memory_space<vmem>>, vector<128x128xf32>
    %c0_2 = arith.constant 0 : index
    %c0_3 = arith.constant 0 : index
    %4 = vector.load %arg2[%c0_2, %c0_3] : memref<128x128xbf16, #tpu.memory_space<vmem>>, vector<128x128xbf16>
    %c0_4 = arith.constant 0 : index
    %c0_5 = arith.constant 0 : index
    %5 = vector.load %arg3[%c0_4, %c0_5] : memref<128x128xbf16, #tpu.memory_space<vmem>>, vector<128x128xbf16>
    %cst = arith.constant dense<0.000000e+00> : vector<128x128xf32>
    %6 = tpu.matmul %4, %5, %cst {dimension_numbers = #tpu.dot_dimension_numbers<[1], [0], [0], [1], [0, 0, 1, 1], [], []>} : vector<128x128xbf16>, vector<128x128xbf16>, vector<128x128xf32> -> vector<128x128xf32>
    %7 = arith.addf %3, %6 : vector<128x128xf32>
    %c0_6 = arith.constant 0 : index
    %c0_7 = arith.constant 0 : index
    %8 = vector.load %arg6[%c0_6, %c0_7] : memref<128x128xf32, #tpu.memory_space<vmem>>, vector<128x128xf32>
    tpu.vector_store %arg6[%c0_6, %c0_7], %7 {strides = array<i32>} : memref<128x128xf32, #tpu.memory_space<vmem>>, vector<128x128xf32>,
    %c0_i32_8 = arith.constant 0 : i32
    %9 = arith.cmpi eq, %arg1, %c0_i32_8 : i32
    %10 = arith.extui %9 : i1 to i32
    %c0_i32_9 = arith.constant 0 : i32
    %11 = arith.cmpi ne, %10, %c0_i32_9 : i32
    scf.if %11 {
      %c0_10 = arith.constant 0 : index
      %c0_11 = arith.constant 0 : index
      %12 = vector.load %arg6[%c0_10, %c0_11] : memref<128x128xf32, #tpu.memory_space<vmem>>, vector<128x128xf32>
      %c0_12 = arith.constant 0 : index
      %c0_13 = arith.constant 0 : index
      %13 = vector.load %arg4[%c0_12, %c0_13] : memref<1x128xf32, #tpu.memory_space<vmem>>, vector<1x128xf32>
      %14 = vector.broadcast %13 : vector<1x128xf32> to vector<128x128xf32>
      %15 = arith.addf %12, %14 : vector<128x128xf32>
      %c0_14 = arith.constant 0 : index
      %c0_15 = arith.constant 0 : index
      %16 = vector.load %arg5[%c0_14, %c0_15] : memref<128x128xf32, #tpu.memory_space<vmem>>, vector<128x128xf32>
      tpu.vector_store %arg5[%c0_14, %c0_15], %15 {strides = array<i32>} : memref<128x128xf32, #tpu.memory_space<vmem>>, vector<128x128xf32>,
    } else {
    }
    return
  }
  func.func @transform_0(%arg0: i32, %arg1: i32) -> (i32, i32) {
    %c0_i32 = arith.constant 0 : i32
    return %arg0, %arg1 : i32, i32
  }
  func.func @transform_1(%arg0: i32, %arg1: i32) -> (i32, i32) {
    %c0_i32 = arith.constant 0 : i32
    %c0_i32_0 = arith.constant 0 : i32
    return %arg1, %c0_i32 : i32, i32
  }
  func.func @transform_2(%arg0: i32, %arg1: i32) -> (i32, i32) {
    %c0_i32 = arith.constant 0 : i32
    %c0_i32_0 = arith.constant 0 : i32
    %c0_i32_1 = arith.constant 0 : i32
    return %c0_i32, %c0_i32_0 : i32, i32
  }
  func.func @transform_3(%arg0: i32, %arg1: i32) -> (i32, i32) {
    %c0_i32 = arith.constant 0 : i32
    %c0_i32_0 = arith.constant 0 : i32
    return %arg0, %c0_i32 : i32, i32
  }
}

</mosaic_0001>

<bundles_post_ra>
// kernel: _gcn_forward_impl.6
= control target key start
LH: loop header
LB: loop body
LE: loop exit
PB: predicated region body
PF: predicated region fallthrough
CT: control target
= control target key end

     0   :  { %s583_s1 = inlined_call_operand.vmem [shape: bf16[128,128], index: 1, kind: input, shape index: {}]   ;;  %s584_s0 = inlined_call_operand.vmem [shape: bf16[128,128], index: 0, kind: input, shape index: {}]   ;;  %s585_s2 = inlined_call_operand.vmem [shape: bf16[128,128], index: 2, kind: output, shape index: {}]  }
   0x1   :  { %v480_v0 = vld [vmem:[%s583_s1 + $0x38] sm:$0xff]   ;;  %v481_v1 = vld [vmem:[%s583_s1 + $0x30] sm:$0xff]   ;;  %v482_v2 = vld [vmem:[%s583_s1 + $0x28] sm:$0xff]  }
   0x2   :  { %432 = vmatprep.subr.bf16.mxu0 %v480_v0  ;;  %464 = vmatprep.subr.bf16.mxu1 %v480_v0  ;;  %v483_v3 = vld [vmem:[%s583_s1 + $0x20] sm:$0xff]   ;;  %v484_v6 = vld [vmem:[%s583_s1 + $0x18] sm:$0xff]   ;;  %v485_v7 = vld [vmem:[%s583_s1 + $0x10] sm:$0xff]  }
   0x3   :  { %433 = vmatpush3.bf16.msra.mxu0 %v480_v0  ;;  %472 = vmatpush3.bf16.msra.mxu1 %v480_v0  ;;  %v488_v4 = vld [vmem:[%s584_s0] sm:$0xff]   ;;  %v486_v8 = vld [vmem:[%s583_s1 + $0x8] sm:$0xff]   ;;  %v492_v12 = vld [vmem:[%s584_s0 + $0x10] sm:$0xff]  }
   0x4   :  { %434 = vmatprep.subr.bf16.mxu0 %v481_v1  ;;  %465 = vmatprep.subr.bf16.mxu1 %v481_v1  ;;  %v489_v5 = vld [vmem:[%s584_s0 + $0x20] sm:$0xff]   ;;  %v490_v10 = vld [vmem:[%s584_s0 + $0x8] sm:$0xff]   ;;  %v493_v13 = vld [vmem:[%s584_s0 + $0x30] sm:$0xff]  }
   0x5   :  { %448 = vmatprep.mubr.bf16.mxu0 %v488_v4  ;;  %456 = vmatprep.mubr.bf16.mxu1 %v489_v5  ;;  %v487_v9 = vld [vmem:[%s583_s1] sm:$0xff]   ;;  %v491_v11 = vld [vmem:[%s584_s0 + $0x28] sm:$0xff]   ;;  %v494_v14 = vld [vmem:[%s584_s0 + $0x18] sm:$0xff]  }
   0x6   :  { %v495_v15 = vld [vmem:[%s584_s0 + $0x38] sm:$0xff]  }
   0x7   :  { %435 = vmatpush3.bf16.msra.mxu0 %v481_v1  ;;  %473 = vmatpush3.bf16.msra.mxu1 %v481_v1 }
   0x8   :  { %436 = vmatprep.subr.bf16.mxu0 %v482_v2  ;;  %466 = vmatprep.subr.bf16.mxu1 %v482_v2 }
   0xb   :  { %437 = vmatpush3.bf16.msra.mxu0 %v482_v2  ;;  %474 = vmatpush3.bf16.msra.mxu1 %v482_v2 }
   0xc   :  { %438 = vmatprep.subr.bf16.mxu0 %v483_v3  ;;  %467 = vmatprep.subr.bf16.mxu1 %v483_v3 }
   0xf   :  { %439 = vmatpush3.bf16.msra.mxu0 %v483_v3  ;;  %475 = vmatpush3.bf16.msra.mxu1 %v483_v3 }
  0x10   :  { %440 = vmatprep.subr.bf16.mxu0 %v484_v6  ;;  %468 = vmatprep.subr.bf16.mxu1 %v484_v6 }
  0x13   :  { %441 = vmatpush3.bf16.msra.mxu0 %v484_v6  ;;  %476 = vmatpush3.bf16.msra.mxu1 %v484_v6 }
  0x14   :  { %442 = vmatprep.subr.bf16.mxu0 %v485_v7  ;;  %469 = vmatprep.subr.bf16.mxu1 %v485_v7 }
  0x17   :  { %443 = vmatpush3.bf16.msra.mxu0 %v485_v7  ;;  %477 = vmatpush3.bf16.msra.mxu1 %v485_v7 }
  0x18   :  { %444 = vmatprep.subr.bf16.mxu0 %v486_v8  ;;  %470 = vmatprep.subr.bf16.mxu1 %v486_v8 }
  0x1b   :  { %445 = vmatpush3.bf16.msra.mxu0 %v486_v8  ;;  %478 = vmatpush3.bf16.msra.mxu1 %v486_v8 }
  0x1c   :  { %446 = vmatprep.subr.bf16.mxu0 %v487_v9  ;;  %471 = vmatprep.subr.bf16.mxu1 %v487_v9 }
  0x1f   :  { %447 = vmatpush3.bf16.msra.mxu0 %v487_v9  ;;  %479 = vmatpush3.bf16.msra.mxu1 %v487_v9 }
  0x22   :  { %449 = vmatmul.mubr.bf16.vlgmr.msra.gmra.mxu0 %v490_v10  ;;  %457 = vmatmul.mubr.bf16.vlgmr.msra.gmra.mxu1 %v491_v11 }
  0x23   :  { %452 = vmatprep.mubr.bf16.mxu0 %v492_v12  ;;  %460 = vmatprep.mubr.bf16.mxu1 %v493_v13 }
  0x2a   :  { %453 = vmatmul.mubr.bf16.gmra.mxu0 %v494_v14  ;;  %461 = vmatmul.mubr.bf16.gmra.mxu1 %v495_v15 }
  0xe2   :  { %v450_v16 = vpop.f32.mrf.mxu0  ;;  %v458_v17 = vpop.f32.mrf.mxu1 }
  0xe4   :  { %v174_v18 = vpop.f32.mrf.mxu0  ;;  %v206_v19 = vpop.f32.mrf.mxu1 }
  0xe6   :  { %v451_v20 = vpop.f32.mrf.mxu0  ;;  %v459_v21 = vpop.f32.mrf.mxu1 }
  0xe7   :  { %v377_v22 = vpack.c.bf16 %v451_v20, %v450_v16  ;;  %v397_v23 = vpack.c.bf16 %v459_v21, %v458_v17 }
  0xe8   :  { %v177_v24 = vpop.f32.mrf.mxu0  ;;  %v209_v25 = vpop.f32.mrf.mxu1 }
  0xe9   :  { %409 = vst [vmem:[%s585_s2 + $0x8] sm:$0xff] %v377_v22   ;;  %413 = vst [vmem:[%s585_s2 + $0x28] sm:$0xff] %v397_v23   ;;  %v372_v26 = vpack.c.bf16 %v177_v24, %v174_v18  ;;  %v392_v27 = vpack.c.bf16 %v209_v25, %v206_v19 }
  0xea   :  { %v454_v28 = vpop.f32.mrf.mxu0  ;;  %v462_v29 = vpop.f32.mrf.mxu1 }
  0xeb   :  { %373 = vst [vmem:[%s585_s2] sm:$0xff] %v372_v26   ;;  %412 = vst [vmem:[%s585_s2 + $0x20] sm:$0xff] %v392_v27  }
  0xec   :  { %v190_v30 = vpop.f32.mrf.mxu0  ;;  %v222_v31 = vpop.f32.mrf.mxu1 }
  0xee   :  { %v455_v32 = vpop.f32.mrf.mxu0  ;;  %v463_v33 = vpop.f32.mrf.mxu1 }
  0xef   :  { %v387_v34 = vpack.c.bf16 %v455_v32, %v454_v28  ;;  %v407_v35 = vpack.c.bf16 %v463_v33, %v462_v29 }
  0xf0   :  { %v193_v36 = vpop.f32.mrf.mxu0  ;;  %v225_v37 = vpop.f32.mrf.mxu1 }
  0xf1   :  { %411 = vst [vmem:[%s585_s2 + $0x18] sm:$0xff] %v387_v34   ;;  %415 = vst [vmem:[%s585_s2 + $0x38] sm:$0xff] %v407_v35   ;;  %v382_v38 = vpack.c.bf16 %v193_v36, %v190_v30  ;;  %v402_v39 = vpack.c.bf16 %v225_v37, %v222_v31 }
  0xf3   :  { %410 = vst [vmem:[%s585_s2 + $0x10] sm:$0xff] %v382_v38   ;;  %414 = vst [vmem:[%s585_s2 + $0x30] sm:$0xff] %v402_v39  }

// kernel: _gcn_forward_impl.7
= control target key start
LH: loop header
LB: loop body
LE: loop exit
PB: predicated region body
PF: predicated region fallthrough
CT: control target
= control target key end

     0   :  { %s721_s1 = inlined_call_operand.vmem [shape: bf16[128,128], index: 1, kind: input, shape index: {}]   ;;  %s722_s0 = inlined_call_operand.vmem [shape: bf16[128,128], index: 0, kind: input, shape index: {}]   ;;  %s723_s2 = inlined_call_operand.vmem [shape: f32[1,128], index: 2, kind: input, shape index: {}]   ;;  %s724_s3 = inlined_call_operand.vmem [shape: bf16[128,128], index: 3, kind: output, shape index: {}]  }
   0x1   :  { %v610_v0 = vld [vmem:[%s721_s1 + $0x38] sm:$0xff]   ;;  %v611_v1 = vld [vmem:[%s721_s1 + $0x30] sm:$0xff]   ;;  %v612_v2 = vld [vmem:[%s721_s1 + $0x28] sm:$0xff]  }
   0x2   :  { %562 = vmatprep.subr.bf16.mxu0 %v610_v0  ;;  %594 = vmatprep.subr.bf16.mxu1 %v610_v0  ;;  %v613_v3 = vld [vmem:[%s721_s1 + $0x20] sm:$0xff]   ;;  %v614_v6 = vld [vmem:[%s721_s1 + $0x18] sm:$0xff]   ;;  %v615_v7 = vld [vmem:[%s721_s1 + $0x10] sm:$0xff]  }
   0x3   :  { %563 = vmatpush3.bf16.msra.mxu0 %v610_v0  ;;  %602 = vmatpush3.bf16.msra.mxu1 %v610_v0  ;;  %v618_v4 = vld [vmem:[%s722_s0] sm:$0xff]   ;;  %v616_v8 = vld [vmem:[%s721_s1 + $0x8] sm:$0xff]   ;;  %v622_v12 = vld [vmem:[%s722_s0 + $0x10] sm:$0xff]  }
   0x4   :  { %564 = vmatprep.subr.bf16.mxu0 %v611_v1  ;;  %595 = vmatprep.subr.bf16.mxu1 %v611_v1  ;;  %v619_v5 = vld [vmem:[%s722_s0 + $0x20] sm:$0xff]   ;;  %v620_v10 = vld [vmem:[%s722_s0 + $0x8] sm:$0xff]   ;;  %v623_v13 = vld [vmem:[%s722_s0 + $0x30] sm:$0xff]  }
   0x5   :  { %578 = vmatprep.mubr.bf16.mxu0 %v618_v4  ;;  %586 = vmatprep.mubr.bf16.mxu1 %v619_v5  ;;  %v617_v9 = vld [vmem:[%s721_s1] sm:$0xff]   ;;  %v621_v11 = vld [vmem:[%s722_s0 + $0x28] sm:$0xff]   ;;  %v624_v14 = vld [vmem:[%s722_s0 + $0x18] sm:$0xff]  }
   0x6   :  { %v625_v15 = vld [vmem:[%s722_s0 + $0x38] sm:$0xff]   ;;  %v466_v16 = vld [vmem:[%s723_s2] ss:$0 sm:$0xff] }
   0x7   :  { %565 = vmatpush3.bf16.msra.mxu0 %v611_v1  ;;  %603 = vmatpush3.bf16.msra.mxu1 %v611_v1 }
   0x8   :  { %566 = vmatprep.subr.bf16.mxu0 %v612_v2  ;;  %596 = vmatprep.subr.bf16.mxu1 %v612_v2 }
   0xb   :  { %567 = vmatpush3.bf16.msra.mxu0 %v612_v2  ;;  %604 = vmatpush3.bf16.msra.mxu1 %v612_v2 }
   0xc   :  { %568 = vmatprep.subr.bf16.mxu0 %v613_v3  ;;  %597 = vmatprep.subr.bf16.mxu1 %v613_v3 }
   0xf   :  { %569 = vmatpush3.bf16.msra.mxu0 %v613_v3  ;;  %605 = vmatpush3.bf16.msra.mxu1 %v613_v3 }
  0x10   :  { %570 = vmatprep.subr.bf16.mxu0 %v614_v6  ;;  %598 = vmatprep.subr.bf16.mxu1 %v614_v6 }
  0x13   :  { %571 = vmatpush3.bf16.msra.mxu0 %v614_v6  ;;  %606 = vmatpush3.bf16.msra.mxu1 %v614_v6 }
  0x14   :  { %572 = vmatprep.subr.bf16.mxu0 %v615_v7  ;;  %599 = vmatprep.subr.bf16.mxu1 %v615_v7 }
  0x17   :  { %573 = vmatpush3.bf16.msra.mxu0 %v615_v7  ;;  %607 = vmatpush3.bf16.msra.mxu1 %v615_v7 }
  0x18   :  { %574 = vmatprep.subr.bf16.mxu0 %v616_v8  ;;  %600 = vmatprep.subr.bf16.mxu1 %v616_v8 }
  0x1b   :  { %575 = vmatpush3.bf16.msra.mxu0 %v616_v8  ;;  %608 = vmatpush3.bf16.msra.mxu1 %v616_v8 }
  0x1c   :  { %576 = vmatprep.subr.bf16.mxu0 %v617_v9  ;;  %601 = vmatprep.subr.bf16.mxu1 %v617_v9 }
  0x1f   :  { %577 = vmatpush3.bf16.msra.mxu0 %v617_v9  ;;  %609 = vmatpush3.bf16.msra.mxu1 %v617_v9 }
  0x22   :  { %579 = vmatmul.mubr.bf16.vlgmr.msra.gmra.mxu0 %v620_v10  ;;  %587 = vmatmul.mubr.bf16.vlgmr.msra.gmra.mxu1 %v621_v11 }
  0x23   :  { %582 = vmatprep.mubr.bf16.mxu0 %v622_v12  ;;  %590 = vmatprep.mubr.bf16.mxu1 %v623_v13 }
  0x2a   :  { %583 = vmatmul.mubr.bf16.gmra.mxu0 %v624_v14  ;;  %591 = vmatmul.mubr.bf16.gmra.mxu1 %v625_v15 }
  0xe2   :  { %v580_v17 = vpop.f32.mrf.mxu0  ;;  %v588_v18 = vpop.f32.mrf.mxu1 }
  0xe3   :  { %v336_v19 = vadd.f32 %v580_v17, %v466_v16  ;;  %v344_v20 = vadd.f32 %v588_v18, %v466_v16 }
  0xe4   :  { %v213_v21 = vpop.f32.mrf.mxu0  ;;  %v245_v22 = vpop.f32.mrf.mxu1 }
  0xe5   :  { %v334_v23 = vadd.f32 %v466_v16, %v213_v21  ;;  %v342_v24 = vadd.f32 %v466_v16, %v245_v22  ;;  %v352_v29 = vmax.f32 %v336_v19, 0.0  ;;  %v360_v30 = vmax.f32 %v344_v20, 0.0 }
  0xe6   :  { %v581_v25 = vpop.f32.mrf.mxu0  ;;  %v589_v26 = vpop.f32.mrf.mxu1 }
  0xe7   :  { %v337_v27 = vadd.f32 %v581_v25, %v466_v16  ;;  %v345_v28 = vadd.f32 %v589_v26, %v466_v16  ;;  %v350_v37 = vmax.f32 %v334_v23, 0.0  ;;  %v358_v38 = vmax.f32 %v342_v24, 0.0 }
  0xe8   :  { %v216_v31 = vpop.f32.mrf.mxu0  ;;  %v248_v32 = vpop.f32.mrf.mxu1 }
  0xe9   :  { %v353_v33 = vmax.f32 %v337_v27, 0.0  ;;  %v361_v34 = vmax.f32 %v345_v28, 0.0  ;;  %v335_v35 = vadd.f32 %v466_v16, %v216_v31  ;;  %v343_v36 = vadd.f32 %v466_v16, %v248_v32 }
  0xea   :  { %v584_v39 = vpop.f32.mrf.mxu0  ;;  %v592_v40 = vpop.f32.mrf.mxu1 }
  0xeb   :  { %v507_v41 = vpack.c.bf16 %v353_v33, %v352_v29  ;;  %v527_v42 = vpack.c.bf16 %v361_v34, %v360_v30  ;;  %v351_v43 = vmax.f32 %v335_v35, 0.0  ;;  %v359_v44 = vmax.f32 %v343_v36, 0.0 }
  0xec   :  { %v340_v45 = vadd.f32 %v584_v39, %v466_v16  ;;  %v348_v46 = vadd.f32 %v592_v40, %v466_v16  ;;  %v229_v47 = vpop.f32.mrf.mxu0  ;;  %v261_v48 = vpop.f32.mrf.mxu1 }
  0xed   :  { %539 = vst [vmem:[%s724_s3 + $0x8] sm:$0xff] %v507_v41   ;;  %543 = vst [vmem:[%s724_s3 + $0x28] sm:$0xff] %v527_v42   ;;  %v502_v49 = vpack.c.bf16 %v351_v43, %v350_v37  ;;  %v522_v50 = vpack.c.bf16 %v359_v44, %v358_v38  ;;  %v338_v51 = vadd.f32 %v466_v16, %v229_v47 }
  0xee   :  { %v346_v52 = vadd.f32 %v466_v16, %v261_v48  ;;  %v585_v53 = vpop.f32.mrf.mxu0  ;;  %v593_v54 = vpop.f32.mrf.mxu1  ;;  %v356_v57 = vmax.f32 %v340_v45, 0.0  ;;  %v364_v58 = vmax.f32 %v348_v46, 0.0 }
  0xef   :  { %503 = vst [vmem:[%s724_s3] sm:$0xff] %v502_v49   ;;  %542 = vst [vmem:[%s724_s3 + $0x20] sm:$0xff] %v522_v50   ;;  %v341_v55 = vadd.f32 %v585_v53, %v466_v16  ;;  %v349_v56 = vadd.f32 %v593_v54, %v466_v16  ;;  %v354_v1 = vmax.f32 %v338_v51, 0.0 }
  0xf0   :  { %v232_v59 = vpop.f32.mrf.mxu0  ;;  %v264_v60 = vpop.f32.mrf.mxu1  ;;  %v362_v2 = vmax.f32 %v346_v52, 0.0 }
  0xf1   :  { %v357_v61 = vmax.f32 %v341_v55, 0.0  ;;  %v365_v62 = vmax.f32 %v349_v56, 0.0  ;;  %v339_v63 = vadd.f32 %v466_v16, %v232_v59  ;;  %v347_v0 = vadd.f32 %v466_v16, %v264_v60 }
  0xf3   :  { %v517_v3 = vpack.c.bf16 %v357_v61, %v356_v57  ;;  %v537_v4 = vpack.c.bf16 %v365_v62, %v364_v58  ;;  %v355_v5 = vmax.f32 %v339_v63, 0.0  ;;  %v363_v6 = vmax.f32 %v347_v0, 0.0 }
  0xf5   :  { %541 = vst [vmem:[%s724_s3 + $0x18] sm:$0xff] %v517_v3   ;;  %545 = vst [vmem:[%s724_s3 + $0x38] sm:$0xff] %v537_v4   ;;  %v512_v7 = vpack.c.bf16 %v355_v5, %v354_v1  ;;  %v532_v8 = vpack.c.bf16 %v363_v6, %v362_v2 }
  0xf7   :  { %540 = vst [vmem:[%s724_s3 + $0x10] sm:$0xff] %v512_v7   ;;  %544 = vst [vmem:[%s724_s3 + $0x30] sm:$0xff] %v532_v8  }

// kernel: _gcn_forward_impl.11
= control target key start
LH: loop header
LB: loop body
LE: loop exit
PB: predicated region body
PF: predicated region fallthrough
CT: control target
= control target key end

     0   :  { %s586_s1 = inlined_call_operand.vmem [shape: bf16[128,128], index: 1, kind: input, shape index: {}]   ;;  %s587_s0 = inlined_call_operand.vmem [shape: bf16[128,128], index: 0, kind: input, shape index: {}]   ;;  %s588_s2 = inlined_call_operand.vmem [shape: f32[1,128], index: 2, kind: input, shape index: {}]   ;;  %s589_s3 = inlined_call_operand.vmem [shape: f32[128,128], index: 3, kind: output, shape index: {}]  }
   0x1   :  { %v451_v0 = vld [vmem:[%s586_s1 + $0x38] sm:$0xff]   ;;  %v452_v1 = vld [vmem:[%s586_s1 + $0x30] sm:$0xff]   ;;  %v453_v2 = vld [vmem:[%s586_s1 + $0x28] sm:$0xff]  }
   0x2   :  { %403 = vmatprep.subr.bf16.mxu0 %v451_v0  ;;  %435 = vmatprep.subr.bf16.mxu1 %v451_v0  ;;  %v454_v3 = vld [vmem:[%s586_s1 + $0x20] sm:$0xff]   ;;  %v455_v6 = vld [vmem:[%s586_s1 + $0x18] sm:$0xff]   ;;  %v456_v7 = vld [vmem:[%s586_s1 + $0x10] sm:$0xff]  }
   0x3   :  { %404 = vmatpush3.bf16.msra.mxu0 %v451_v0  ;;  %443 = vmatpush3.bf16.msra.mxu1 %v451_v0  ;;  %v459_v4 = vld [vmem:[%s587_s0] sm:$0xff]   ;;  %v457_v8 = vld [vmem:[%s586_s1 + $0x8] sm:$0xff]   ;;  %v463_v12 = vld [vmem:[%s587_s0 + $0x10] sm:$0xff]  }
   0x4   :  { %405 = vmatprep.subr.bf16.mxu0 %v452_v1  ;;  %436 = vmatprep.subr.bf16.mxu1 %v452_v1  ;;  %v460_v5 = vld [vmem:[%s587_s0 + $0x20] sm:$0xff]   ;;  %v461_v10 = vld [vmem:[%s587_s0 + $0x8] sm:$0xff]   ;;  %v464_v13 = vld [vmem:[%s587_s0 + $0x30] sm:$0xff]  }
   0x5   :  { %419 = vmatprep.mubr.bf16.mxu0 %v459_v4  ;;  %427 = vmatprep.mubr.bf16.mxu1 %v460_v5  ;;  %v458_v9 = vld [vmem:[%s586_s1] sm:$0xff]   ;;  %v462_v11 = vld [vmem:[%s587_s0 + $0x28] sm:$0xff]   ;;  %v465_v14 = vld [vmem:[%s587_s0 + $0x18] sm:$0xff]  }
   0x6   :  { %v466_v15 = vld [vmem:[%s587_s0 + $0x38] sm:$0xff]   ;;  %v386_v16 = vld [vmem:[%s588_s2] ss:$0 sm:$0xff] }
   0x7   :  { %406 = vmatpush3.bf16.msra.mxu0 %v452_v1  ;;  %444 = vmatpush3.bf16.msra.mxu1 %v452_v1 }
   0x8   :  { %407 = vmatprep.subr.bf16.mxu0 %v453_v2  ;;  %437 = vmatprep.subr.bf16.mxu1 %v453_v2 }
   0xb   :  { %408 = vmatpush3.bf16.msra.mxu0 %v453_v2  ;;  %445 = vmatpush3.bf16.msra.mxu1 %v453_v2 }
   0xc   :  { %409 = vmatprep.subr.bf16.mxu0 %v454_v3  ;;  %438 = vmatprep.subr.bf16.mxu1 %v454_v3 }
   0xf   :  { %410 = vmatpush3.bf16.msra.mxu0 %v454_v3  ;;  %446 = vmatpush3.bf16.msra.mxu1 %v454_v3 }
  0x10   :  { %411 = vmatprep.subr.bf16.mxu0 %v455_v6  ;;  %439 = vmatprep.subr.bf16.mxu1 %v455_v6 }
  0x13   :  { %412 = vmatpush3.bf16.msra.mxu0 %v455_v6  ;;  %447 = vmatpush3.bf16.msra.mxu1 %v455_v6 }
  0x14   :  { %413 = vmatprep.subr.bf16.mxu0 %v456_v7  ;;  %440 = vmatprep.subr.bf16.mxu1 %v456_v7 }
  0x17   :  { %414 = vmatpush3.bf16.msra.mxu0 %v456_v7  ;;  %448 = vmatpush3.bf16.msra.mxu1 %v456_v7 }
  0x18   :  { %415 = vmatprep.subr.bf16.mxu0 %v457_v8  ;;  %441 = vmatprep.subr.bf16.mxu1 %v457_v8 }
  0x1b   :  { %416 = vmatpush3.bf16.msra.mxu0 %v457_v8  ;;  %449 = vmatpush3.bf16.msra.mxu1 %v457_v8 }
  0x1c   :  { %417 = vmatprep.subr.bf16.mxu0 %v458_v9  ;;  %442 = vmatprep.subr.bf16.mxu1 %v458_v9 }
  0x1f   :  { %418 = vmatpush3.bf16.msra.mxu0 %v458_v9  ;;  %450 = vmatpush3.bf16.msra.mxu1 %v458_v9 }
  0x22   :  { %420 = vmatmul.mubr.bf16.vlgmr.msra.gmra.mxu0 %v461_v10  ;;  %428 = vmatmul.mubr.bf16.vlgmr.msra.gmra.mxu1 %v462_v11 }
  0x23   :  { %423 = vmatprep.mubr.bf16.mxu0 %v463_v12  ;;  %431 = vmatprep.mubr.bf16.mxu1 %v464_v13 }
  0x2a   :  { %424 = vmatmul.mubr.bf16.gmra.mxu0 %v465_v14  ;;  %432 = vmatmul.mubr.bf16.gmra.mxu1 %v466_v15 }
  0xe2   :  { %v421_v17 = vpop.f32.mrf.mxu0  ;;  %v429_v18 = vpop.f32.mrf.mxu1 }
  0xe3   :  { %v336_v19 = vadd.f32 %v421_v17, %v386_v16  ;;  %v344_v20 = vadd.f32 %v429_v18, %v386_v16 }
  0xe4   :  { %v213_v21 = vpop.f32.mrf.mxu0  ;;  %v245_v22 = vpop.f32.mrf.mxu1 }
  0xe5   :  { %352 = vst [vmem:[%s589_s3 + $0x10] sm:$0xff] %v336_v19  ;;  %360 = vst [vmem:[%s589_s3 + $0x50] sm:$0xff] %v344_v20  ;;  %v334_v23 = vadd.f32 %v386_v16, %v213_v21  ;;  %v342_v24 = vadd.f32 %v386_v16, %v245_v22 }
  0xe6   :  { %v422_v25 = vpop.f32.mrf.mxu0  ;;  %v430_v26 = vpop.f32.mrf.mxu1 }
  0xe7   :  { %350 = vst [vmem:[%s589_s3] sm:$0xff] %v334_v23  ;;  %358 = vst [vmem:[%s589_s3 + $0x40] sm:$0xff] %v342_v24  ;;  %v337_v27 = vadd.f32 %v422_v25, %v386_v16  ;;  %v345_v28 = vadd.f32 %v430_v26, %v386_v16 }
  0xe8   :  { %v216_v29 = vpop.f32.mrf.mxu0  ;;  %v248_v30 = vpop.f32.mrf.mxu1 }
  0xe9   :  { %353 = vst [vmem:[%s589_s3 + $0x18] sm:$0xff] %v337_v27  ;;  %361 = vst [vmem:[%s589_s3 + $0x58] sm:$0xff] %v345_v28  ;;  %v335_v31 = vadd.f32 %v386_v16, %v216_v29  ;;  %v343_v32 = vadd.f32 %v386_v16, %v248_v30 }
  0xea   :  { %v425_v33 = vpop.f32.mrf.mxu0  ;;  %v433_v34 = vpop.f32.mrf.mxu1 }
  0xeb   :  { %351 = vst [vmem:[%s589_s3 + $0x8] sm:$0xff] %v335_v31  ;;  %359 = vst [vmem:[%s589_s3 + $0x48] sm:$0xff] %v343_v32  ;;  %v340_v35 = vadd.f32 %v425_v33, %v386_v16  ;;  %v348_v36 = vadd.f32 %v433_v34, %v386_v16 }
  0xec   :  { %v229_v37 = vpop.f32.mrf.mxu0  ;;  %v261_v38 = vpop.f32.mrf.mxu1 }
  0xed   :  { %356 = vst [vmem:[%s589_s3 + $0x30] sm:$0xff] %v340_v35  ;;  %364 = vst [vmem:[%s589_s3 + $0x70] sm:$0xff] %v348_v36  ;;  %v338_v39 = vadd.f32 %v386_v16, %v229_v37  ;;  %v346_v40 = vadd.f32 %v386_v16, %v261_v38 }
  0xee   :  { %v426_v41 = vpop.f32.mrf.mxu0  ;;  %v434_v42 = vpop.f32.mrf.mxu1 }
  0xef   :  { %354 = vst [vmem:[%s589_s3 + $0x20] sm:$0xff] %v338_v39  ;;  %362 = vst [vmem:[%s589_s3 + $0x60] sm:$0xff] %v346_v40  ;;  %v341_v43 = vadd.f32 %v426_v41, %v386_v16  ;;  %v349_v44 = vadd.f32 %v434_v42, %v386_v16 }
  0xf0   :  { %v232_v45 = vpop.f32.mrf.mxu0  ;;  %v264_v46 = vpop.f32.mrf.mxu1 }
  0xf1   :  { %357 = vst [vmem:[%s589_s3 + $0x38] sm:$0xff] %v341_v43  ;;  %365 = vst [vmem:[%s589_s3 + $0x78] sm:$0xff] %v349_v44  ;;  %v339_v47 = vadd.f32 %v386_v16, %v232_v45  ;;  %v347_v48 = vadd.f32 %v386_v16, %v264_v46 }
  0xf3   :  { %355 = vst [vmem:[%s589_s3 + $0x28] sm:$0xff] %v339_v47  ;;  %363 = vst [vmem:[%s589_s3 + $0x68] sm:$0xff] %v347_v48 }

</bundles_post_ra>
